<compile_context>
chip_gen: v6e
topology: v6e:2x2x1
jax: 0.10.0
libtpu: 0.0.40
codegen_flags: <defaults>
</compile_context>

<pallas_src>
import jax
import jax.numpy as jnp
from jax.experimental import pallas as pl
from jax.experimental.pallas import tpu as pltpu


def _round_up(v, m):
    return ((v + m - 1) // m) * m


def dummy_actor_kernel(x_ref, w_ref, b_ref, o_ref):
    # x_ref: (TB, S)  w_ref: (S, A_pad)  b_ref: (1, A)  o_ref: (TB, A)
    a = o_ref.shape[-1]
    y = jnp.dot(x_ref[...], w_ref[...], preferred_element_type=jnp.float32)
    # Only the real A columns are written to HBM (pad lanes never leave VMEM).
    o_ref[...] = jnp.tanh(y[:, :a] + b_ref[...]).astype(o_ref.dtype)


def prepare_actor_params(W, b):
    """One-time parameter packing (hoisted out of the per-call forward path).

    W : (A, S) PyTorch-layout weight   -> returns (S, A_pad=128-multiple) padded W.T
    b : (A,)                            -> returns (1, A) bias
    """
    A, S = W.shape
    A_pad = _round_up(A, 128)
    w_pad = jnp.zeros((S, A_pad), W.dtype).at[:, :A].set(W.T)
    b2d = b.reshape(1, A)
    return w_pad, b2d


def dummy_actor_forward(x, w_pad, b2d, *, max_block_b=8192):
    """tanh(x @ W.T + b) via a batch-tiled Pallas kernel.

    x     : (B, S) float32
    w_pad : (S, A_pad) float32  (pre-padded, from prepare_actor_params)
    b2d   : (1, A)   float32
    """
    B, S = x.shape
    S2, A_pad = w_pad.shape
    assert S == S2
    A = b2d.shape[1]

    # Batch tile: aim for >= ~6 grid steps (>= 2-3 per TensorCore on v7x),
    # clamp to [512, max_block_b] to amortize per-step overhead, never exceed
    # the (8-aligned) batch for tiny inputs.
    target = _round_up(pl.cdiv(B, 6), 8)
    TB = max(512, min(target, max_block_b))
    TB = min(TB, _round_up(B, 8))
    grid = (pl.cdiv(B, TB),)  # ragged last block; OOB rows are never written

    cost = pl.CostEstimate(
        flops=2 * B * S * A_pad,
        transcendentals=B * A,
        bytes_accessed=(B * S + S * A_pad + A + B * A) * 4,
    )

    out = pl.pallas_call(
        dummy_actor_kernel,
        out_shape=jax.ShapeDtypeStruct((B, A), x.dtype),
        grid=grid,
        in_specs=[
            pl.BlockSpec((TB, S), lambda i: (i, 0)),        # x: streams per tile
            pl.BlockSpec((S, A_pad), lambda i: (0, 0)),     # w: VMEM-resident
            pl.BlockSpec((1, A), lambda i: (0, 0)),         # b: VMEM-resident
        ],
        out_specs=pl.BlockSpec((TB, A), lambda i: (i, 0)),  # unpadded lane dim
        compiler_params=pltpu.CompilerParams(
            dimension_semantics=("parallel",),              # shard batch across TCs
            vmem_limit_bytes=32 * 1024 * 1024,              # headroom for TB=8192
        ),
        cost_estimate=cost,
    )(x, w_pad, b2d)

    return out


if __name__ == "__main__":
    # Small shapes consistent with DummyActor(state_dim, action_dim).
    batch, state_dim, action_dim = 8, 32, 8

    key = jax.random.PRNGKey(0)
    k_x, k_w, k_b, k_x2 = jax.random.split(key, 4)

    # Deterministic parameter init (mimic nn.Linear's uniform(-1/sqrt(S), 1/sqrt(S))).
    bound = 1.0 / (state_dim ** 0.5)
    W = jax.random.uniform(k_w, (action_dim, state_dim), jnp.float32, -bound, bound)
    b = jax.random.uniform(k_b, (action_dim,), jnp.float32, -bound, bound)

    # Pack parameters ONCE (padding hoisted out of the forward path).
    w_pad, b2d = prepare_actor_params(W, b)

    x = jax.random.normal(k_x, (batch, state_dim), jnp.float32)
    out = jax.block_until_ready(dummy_actor_forward(x, w_pad, b2d))

    ref = jnp.tanh(x @ W.T + b)
    assert out.shape == (batch, action_dim)
    assert jnp.allclose(out, ref, atol=1e-5, rtol=1e-5)

    # Exercise the tiled path with a ragged (non-divisible) larger batch too.
    x_big = jax.random.normal(k_x2, (1000, state_dim), jnp.float32)
    out_big = jax.block_until_ready(dummy_actor_forward(x_big, w_pad, b2d))
    ref_big = jnp.tanh(x_big @ W.T + b)
    assert out_big.shape == (1000, action_dim)
    assert jnp.allclose(out_big, ref_big, atol=1e-5, rtol=1e-5)

    print("KERNEL_OK")
</pallas_src>

<mosaic_0001>
module attributes {stable_mosaic.version = 11 : i64} {
  func.func @dummy_actor_kernel(%arg0: i32, %arg1: memref<8x32xf32, #tpu.memory_space<vmem>>, %arg2: memref<32x128xf32, #tpu.memory_space<vmem>>, %arg3: memref<1x8xf32, #tpu.memory_space<vmem>>, %arg4: memref<8x8xf32, #tpu.memory_space<vmem>>) attributes {dimension_semantics = [#tpu.dimension_semantics<parallel>], iteration_bounds = array<i64: 1>, scalar_prefetch = 0 : i64, scratch_operands = 0 : i64, tpu.core_type = #tpu.core_type<tc>, window_params = [{transform_indices = @transform_0, window_bounds = array<i64: 8, 32>}, {pipeline_mode = #tpu.pipeline_mode<synchronous>, transform_indices = @transform_1, window_bounds = array<i64: 32, 128>}, {pipeline_mode = #tpu.pipeline_mode<synchronous>, transform_indices = @transform_2, window_bounds = array<i64: 1, 8>}, {transform_indices = @transform_3, window_bounds = array<i64: 8, 8>}]} {
    %c0 = arith.constant 0 : index
    %c0_0 = arith.constant 0 : index
    %0 = vector.load %arg1[%c0, %c0_0] : memref<8x32xf32, #tpu.memory_space<vmem>>, vector<8x32xf32>
    %c0_1 = arith.constant 0 : index
    %c0_2 = arith.constant 0 : index
    %1 = vector.load %arg2[%c0_1, %c0_2] : memref<32x128xf32, #tpu.memory_space<vmem>>, vector<32x128xf32>
    %cst = arith.constant dense<0.000000e+00> : vector<8x128xf32>
    %2 = tpu.matmul %0, %1, %cst {dimension_numbers = #tpu.dot_dimension_numbers<[1], [0], [0], [1], [0, 0, 1, 1], [], []>} : vector<8x32xf32>, vector<32x128xf32>, vector<8x128xf32> -> vector<8x128xf32>
    %3 = vector.extract_strided_slice %2 {offsets = [0, 0], sizes = [8, 8], strides = [1, 1]} : vector<8x128xf32> to vector<8x8xf32>
    %c0_3 = arith.constant 0 : index
    %c0_4 = arith.constant 0 : index
    %4 = vector.load %arg3[%c0_3, %c0_4] : memref<1x8xf32, #tpu.memory_space<vmem>>, vector<1x8xf32>
    %5 = vector.broadcast %4 : vector<1x8xf32> to vector<8x8xf32>
    %6 = arith.addf %3, %5 : vector<8x8xf32>
    %7 = math.tanh %6 : vector<8x8xf32>
    %c0_5 = arith.constant 0 : index
    %c0_6 = arith.constant 0 : index
    %8 = vector.load %arg4[%c0_5, %c0_6] : memref<8x8xf32, #tpu.memory_space<vmem>>, vector<8x8xf32>
    tpu.vector_store %arg4[%c0_5, %c0_6], %7 {strides = array<i32>} : memref<8x8xf32, #tpu.memory_space<vmem>>, vector<8x8xf32>,
    return
  }
  func.func @transform_0(%arg0: i32) -> (i32, i32) {
    %c0_i32 = arith.constant 0 : i32
    %c0_i32_0 = arith.constant 0 : i32
    return %arg0, %c0_i32 : i32, i32
  }
  func.func @transform_1(%arg0: i32) -> (i32, i32) {
    %c0_i32 = arith.constant 0 : i32
    %c0_i32_0 = arith.constant 0 : i32
    %c0_i32_1 = arith.constant 0 : i32
    return %c0_i32, %c0_i32_0 : i32, i32
  }
  func.func @transform_2(%arg0: i32) -> (i32, i32) {
    %c0_i32 = arith.constant 0 : i32
    %c0_i32_0 = arith.constant 0 : i32
    %c0_i32_1 = arith.constant 0 : i32
    return %c0_i32, %c0_i32_0 : i32, i32
  }
  func.func @transform_3(%arg0: i32) -> (i32, i32) {
    %c0_i32 = arith.constant 0 : i32
    %c0_i32_0 = arith.constant 0 : i32
    return %arg0, %c0_i32 : i32, i32
  }
}

</mosaic_0001>

<bundles_post_ra>
// kernel: tpu_custom_call.1
= control target key start
LH: loop header
LB: loop body
LE: loop exit
PB: predicated region body
PF: predicated region fallthrough
CT: control target
= control target key end

     0   :  { %8 = vsyncpa [#allocation3], 0  ;;  %s279_s0 = inlined_call_operand.hbm [shape: f32[8,32], index: 0, kind: input, shape index: {}]   ;;  %s280_s1 = inlined_call_operand.hbm [shape: f32[32,128], index: 1, kind: input, shape index: {}]   ;;  %s281_s2 = inlined_call_operand.vmem [shape: f32[1,8], index: 2, kind: input, shape index: {}]   ;;  %s282_s3 = inlined_call_operand.hbm [shape: f32[8,8], index: 3, kind: output, shape index: {}]  }
   0x1   :  { %9 = vsyncpa [#allocation6], 0 }
   0x2   :  { %10 = vsyncpa [#allocation4], 0  ;;  %s240_s12 = smov [#allocation2]   ;;  %s241_s14 = smov [#allocation5]  }
   0x3   :  { %s17_s13 = sshll.u32 %s240_s12, 4  ;;  %s26_s15 = sshll.u32 %s241_s14, 4  ;;  %s18_s13 = int_to_ptr.vmem [resolvable:$true] %s17_s13  ;;  %s27_s15 = int_to_ptr.vmem [resolvable:$true] %s26_s15 }
   0x4   :  { %s182_s16 = scalar_lea.vmem %s18_s13, 128  ;;  %p187_p1 = scmp.lt.s32.totalorder %s18_s13, %s18_s13 }
   0x5   :  { %p183_p0 = scmp.ne.s32.totalorder %s18_s13, %s182_s16  ;;  %p188_p2 = scmp.lt.s32.totalorder %s182_s16, %s182_s16 }
   0x7   :  { %p189_p3 = por %p188_p2, %p187_p1 }
   0x9   :  { %p190_p4 = pnand %p189_p3, %p183_p0 }
   0xb   :  { %193 = shalt.err (!%p190_p4)
}
   0xc   :  { %20 = dma.hbm_to_vmem [thread:$0]  %s279_s0, 128, %s18_s13, [#allocation3]  }
   0xd   :  { %s202_s19 = scalar_lea.vmem %s27_s15, 512  ;;  %p207_p6 = scmp.lt.s32.totalorder %s27_s15, %s27_s15 }
   0xe   :  { %p203_p5 = scmp.ne.s32.totalorder %s27_s15, %s202_s19  ;;  %p208_p7 = scmp.lt.s32.totalorder %s202_s19, %s202_s19 }
  0x10   :  { %p209_p8 = por %p208_p7, %p207_p6 }
  0x12   :  { %p210_p9 = pnand %p209_p8, %p203_p5 }
  0x14   :  { %213 = shalt.err (!%p210_p9)
}
  0x15   :  { %s242_s20 = smov 128   ;;  %s243_s21 = smov 8  }
  0x16   :  { %32 = dma.hbm_to_vmem [thread:$0]  %s280_s1, 512, %s27_s15, [#allocation6], %s242_s20, %s242_s20, %s243_s21  }
  0x17   :  { %234 = dma.done.wait [#allocation3], 128  }
  0x18   :  { %235 = vsyncadd [#allocation3], 4294967168 }
  0x19   :  { %236 = dma.done.wait [#allocation6], 512  }
  0x1a   :  { %237 = vsyncadd [#allocation6], 4294966784  ;;  %v244_v0 = vmov 0.0   ;;  %vm245_vm0 = vmmov 0   ;;  %v45_v1 = vld [vmem:[#allocation5 + $0x18] sm:$0xff]  ;;  %v44_v2 = vld [vmem:[#allocation5 + $0x10] sm:$0xff] }
  0x1b   :  { %154 = vmatprep.subr.mxu0 %v244_v0  ;;  %162 = vmatprep.mubr.msk.f32.mxu0 %vm245_vm0, %v244_v0  ;;  %v43_v3 = vld [vmem:[#allocation5 + $0x8] sm:$0xff]  ;;  %v42_v4 = vld [vmem:[#allocation5] sm:$0xff]  ;;  %v41_v5 = vld [vmem:[#allocation2] sm:$0xff]  ;;  %vm46_vm1 = vcmask 261120   ;;  %s246_s24 = smov [#allocation7]   ;;  %vm129_vm2 = vcmask 64512  }
  0x1c   :  { %155 = vmatpush3.msra.mxu0 %v45_v1  ;;  %v148_v6 = vld [vmem:[%s281_s2] ss:$0 sm:$0xff]  ;;  %s137_s25 = sshll.u32 %s246_s24, 4  ;;  %s138_s25 = int_to_ptr.vmem [resolvable:$true] %s137_s25 }
  0x1d   :  { %156 = vmatprep.subr.mxu0 %v244_v0  ;;  %s214_s26 = scalar_lea.vmem %s138_s25, 128  ;;  %p219_p11 = scmp.lt.s32.totalorder %s138_s25, %s138_s25 }
  0x1e   :  { %157 = vmatpush3.msra.mxu0 %v44_v2  ;;  %p215_p10 = scmp.ne.s32.totalorder %s138_s25, %s214_s26  ;;  %p220_p12 = scmp.lt.s32.totalorder %s214_s26, %s214_s26 }
  0x1f   :  { %158 = vmatprep.subr.mxu0 %v244_v0 }
  0x20   :  { %159 = vmatpush3.msra.mxu0 %v43_v3  ;;  %p221_p13 = por %p220_p12, %p219_p11 }
  0x21   :  { %160 = vmatprep.subr.mxu0 %v244_v0 }
  0x22   :  { %161 = vmatpush3.msra.mxu0 %v42_v4  ;;  %p222_p0 = pnand %p221_p13, %p215_p10 }
  0x23   :  { %163 = vmatmul.mubr.msk.f32.vlgmr.msra.gmra.mxu0 %vm46_vm1, %v41_v5 }
  0xe3   :  { %v116_v7 = vpop.f32.mrf.mxu0 }
  0xe4   :  { %v127_v8 = vadd.f32 %v148_v6, %v116_v7 }
  0xe5   :  { %v164_v9 = vpop.f32.mrf.mxu0 }
  0xe6   :  { %172 = vtanh.f32 %v127_v8 }
  0xf3   :  { %v173_v10 = vpop.eup %172 }
  0xf4   :  { %130 = vst.msk [vmem:[#allocation7] sm:$0xff] %vm129_vm2, %v173_v10 }
  0xf5   :  { %225 = shalt.err (!%p222_p0)
}
  0xf6   :  { %140 = dma.vmem_to_hbm [thread:$0]  %s138_s25, 128, %s282_s3, [#allocation4]  }
  0xf7   :  { %238 = dma.done.wait [#allocation4], 128  }
  0xf8   :  { %239 = vsyncadd [#allocation4], 4294967168 }
  0xf9   :  { %144 = vsyncpa [#allocation3], 1 }
  0xfa   :  { %145 = vsyncpa [#allocation6], 1 }
  0xfb   :  { %146 = vsyncpa [#allocation4], 1 }

</bundles_post_ra>
